<compile_context>
chip_gen: v7x
topology: tpu7x:2x2x1
jax: 0.10.0
libtpu: 0.0.40
codegen_flags: <defaults>
</compile_context>

<pallas_src>
import jax
import jax.numpy as jnp
from jax.experimental import pallas as pl
from jax.experimental.pallas import tpu as pltpu


def _policy_kernel(x_ref, w_ref, bias_ref, o_ref):
    # x_ref   : (TB, D)      compute dtype (f32 or bf16)
    # w_ref   : (A_pad, D)   compute dtype, zero-padded action rows
    # bias_ref: (1, A_pad)   f32, 0 for valid action columns / -1e30 for padding
    # o_ref   : (TB, A)      f32 (unpadded action axis)
    logits = jax.lax.dot_general(
        x_ref[...], w_ref[...],
        dimension_numbers=(((1,), (1,)), ((), ())),   # contract D of both (trans-B)
        preferred_element_type=jnp.float32,
    ) + bias_ref[...]                                 # (TB, A_pad); padded cols ~ -1e30

    # Numerically-stable softmax over the action axis (per-row reductions, so stale
    # rows in a partial last batch block cannot contaminate valid rows).
    m = jnp.max(logits, axis=-1, keepdims=True)
    e = jnp.exp(logits - m)                           # padded cols underflow to exactly 0
    denom = jnp.sum(e, axis=-1, keepdims=True)
    r = pl.reciprocal(denom, approx=True)             # EUP slot (nearly free)
    r = r * (2.0 - denom * r)                         # one Newton-Raphson step -> ~f32 accuracy
    probs = e * r

    # Unpadded store: only the real n_actions columns ever hit HBM.
    o_ref[...] = probs[:, : o_ref.shape[1]].astype(o_ref.dtype)


def _round_up(v, m):
    return ((v + m - 1) // m) * m


def policy_net_forward(
    x,
    weight,
    *,
    block_b: int = 1024,
    compute_dtype=jnp.float32,
    vmem_budget_bytes: int = 40 * 1024 * 1024,
):
    """x: (batch, context_dim); weight: (n_actions, context_dim) (PyTorch layout).

    Returns softmax(x @ weight.T, axis=-1) as float32, shape (batch, n_actions).
    """
    B, D = x.shape
    A, D2 = weight.shape
    assert D == D2, (x.shape, weight.shape)

    # Lane-dense matmul N dimension: pad actions to a multiple of 128.
    A_pad = max(128, _round_up(A, 128))
    w_pad = weight if A_pad == A else jnp.pad(weight, ((0, A_pad - A), (0, 0)))
    w_in = w_pad.astype(compute_dtype)
    x_in = x.astype(compute_dtype)

    # Additive mask row: 0 for valid action columns, -1e30 for padded columns.
    col = jnp.arange(A_pad, dtype=jnp.int32)
    bias = jnp.where(col < A, 0.0, -1e30).astype(jnp.float32).reshape(1, A_pad)

    # ---- batch tile selection -------------------------------------------------
    in_bytes = jnp.dtype(compute_dtype).itemsize
    tb = min(block_b, B)

    # Make the "parallel" axis real on v7x: guarantee grid >= 2 for mid/large B.
    if B >= 64 and tb >= B:
        tb = _round_up(pl.cdiv(B, 2), 8)

    # Shrink the tile until it (plus the resident weight/bias and the f32
    # intermediates) fits the explicit VMEM budget.
    fixed_bytes = A_pad * D * in_bytes + A_pad * 4        # single-buffered weight + bias

    def _tile_bytes(t):
        return (2 * t * D * in_bytes                      # x tile, double-buffered
                + 2 * t * A * 4                           # out tile, double-buffered
                + 4 * t * A_pad * 4)                      # f32 intermediates (logits/e/probs + slack)

    while tb > 8 and fixed_bytes + _tile_bytes(tb) > vmem_budget_bytes:
        tb = max(8, _round_up(tb // 2, 8))

    grid = (pl.cdiv(B, tb),)
    vmem_limit = int(min(vmem_budget_bytes + (12 << 20), 56 << 20))  # < v7x 64 MiB/TC

    out = pl.pallas_call(
        _policy_kernel,
        out_shape=jax.ShapeDtypeStruct((B, A), jnp.float32),
        grid_spec=pltpu.PrefetchScalarGridSpec(
            num_scalar_prefetch=0,
            grid=grid,
            in_specs=[
                # x tile, pipelined (double-buffered) over the batch axis.
                pl.BlockSpec((tb, D), lambda i: (i, 0)),
                # weight: constant index_map -> VMEM-resident; single buffer only.
                pl.BlockSpec((A_pad, D), lambda i: (0, 0),
                             pipeline_mode=pl.Buffered(1)),
                # mask bias row: tiny, VMEM-resident, single buffer.
                pl.BlockSpec((1, A_pad), lambda i: (0, 0),
                             pipeline_mode=pl.Buffered(1)),
            ],
            # Unpadded output: last block dim == full array dim (== n_actions).
            out_specs=pl.BlockSpec((tb, A), lambda i: (i, 0)),
        ),
        compiler_params=pltpu.CompilerParams(
            dimension_semantics=("parallel",),   # rows independent -> megacore shard
            vmem_limit_bytes=vmem_limit,
        ),
    )(x_in, w_in, bias)
    return out


if __name__ == "__main__":
    key = jax.random.PRNGKey(0)
    k_x, k_w, k_x2, k_x3 = jax.random.split(key, 4)

    batch = 8
    context_dim = 32   # small, consistent with contextual-bandit context vectors
    n_actions = 16

    x = jax.random.normal(k_x, (batch, context_dim), dtype=jnp.float32)
    # Deterministic init mimicking nn.Linear default (uniform in +-1/sqrt(fan_in)).
    bound = 1.0 / jnp.sqrt(context_dim)
    weight = jax.random.uniform(
        k_w, (n_actions, context_dim), minval=-bound, maxval=bound, dtype=jnp.float32
    )

    # 1) small batch, f32 path (single grid step).
    out = jax.block_until_ready(policy_net_forward(x, weight))
    ref = jax.nn.softmax(x @ weight.T, axis=-1)
    assert out.shape == (batch, n_actions)
    assert jnp.allclose(jnp.sum(out, axis=-1), 1.0, atol=1e-5)
    assert jnp.allclose(out, ref, atol=1e-5)

    # 2) batch-tiled path (grid > 1, partial last block).
    x2 = jax.random.normal(k_x2, (40, context_dim), dtype=jnp.float32)
    out2 = jax.block_until_ready(policy_net_forward(x2, weight, block_b=16))
    ref2 = jax.nn.softmax(x2 @ weight.T, axis=-1)
    assert jnp.allclose(out2, ref2, atol=1e-5)

    # 3) megacore-split path (B >= 64 -> grid >= 2) with a bf16 input stream.
    x3 = jax.random.normal(k_x3, (128, context_dim), dtype=jnp.float32)
    out3 = jax.block_until_ready(
        policy_net_forward(x3, weight, compute_dtype=jnp.bfloat16))
    ref3 = jax.nn.softmax(x3 @ weight.T, axis=-1)
    assert out3.shape == (128, n_actions)
    assert jnp.allclose(jnp.sum(out3, axis=-1), 1.0, atol=1e-4)
    assert jnp.allclose(out3, ref3, atol=5e-3)

    print("KERNEL_OK")
</pallas_src>

<mosaic_0001>
module attributes {stable_mosaic.version = 11 : i64} {
  func.func @_policy_kernel(%arg0: i32, %arg1: memref<8x32xf32, #tpu.memory_space<vmem>>, %arg2: memref<128x32xf32, #tpu.memory_space<vmem>>, %arg3: memref<1x128xf32, #tpu.memory_space<vmem>>, %arg4: memref<8x16xf32, #tpu.memory_space<vmem>>) attributes {dimension_semantics = [#tpu.dimension_semantics<parallel>], iteration_bounds = array<i64: 1>, scalar_prefetch = 0 : i64, scratch_operands = 0 : i64, tpu.core_type = #tpu.core_type<tc>, window_params = [{transform_indices = @transform_0, window_bounds = array<i64: 8, 32>}, {pipeline_mode = #tpu.pipeline_mode<synchronous>, transform_indices = @transform_1, window_bounds = array<i64: 128, 32>}, {pipeline_mode = #tpu.pipeline_mode<synchronous>, transform_indices = @transform_2, window_bounds = array<i64: 1, 128>}, {transform_indices = @transform_3, window_bounds = array<i64: 8, 16>}]} {
    %c0 = arith.constant 0 : index
    %c0_0 = arith.constant 0 : index
    %0 = vector.load %arg1[%c0, %c0_0] : memref<8x32xf32, #tpu.memory_space<vmem>>, vector<8x32xf32>
    %c0_1 = arith.constant 0 : index
    %c0_2 = arith.constant 0 : index
    %1 = vector.load %arg2[%c0_1, %c0_2] : memref<128x32xf32, #tpu.memory_space<vmem>>, vector<128x32xf32>
    %cst = arith.constant dense<0.000000e+00> : vector<8x128xf32>
    %2 = tpu.matmul %0, %1, %cst {dimension_numbers = #tpu.dot_dimension_numbers<[1], [1], [0], [0], [0, 0, 1, 0], [], []>} : vector<8x32xf32>, vector<128x32xf32>, vector<8x128xf32> -> vector<8x128xf32>
    %c0_3 = arith.constant 0 : index
    %c0_4 = arith.constant 0 : index
    %3 = vector.load %arg3[%c0_3, %c0_4] : memref<1x128xf32, #tpu.memory_space<vmem>>, vector<1x128xf32>
    %4 = vector.broadcast %3 : vector<1x128xf32> to vector<8x128xf32>
    %5 = arith.addf %2, %4 : vector<8x128xf32>
    %cst_5 = arith.constant dense<0xFF800000> : vector<8xf32>
    %6 = vector.multi_reduction <maximumf>, %5, %cst_5 [1] : vector<8x128xf32> to vector<8xf32>
    %7 = vector.shape_cast %6 : vector<8xf32> to vector<8x1xf32>
    %8 = vector.broadcast %7 : vector<8x1xf32> to vector<8x128xf32>
    %9 = arith.subf %5, %8 : vector<8x128xf32>
    %10 = math.exp %9 : vector<8x128xf32>
    %cst_6 = arith.constant dense<0.000000e+00> : vector<8xf32>
    %11 = vector.multi_reduction <add>, %10, %cst_6 [1] : vector<8x128xf32> to vector<8xf32>
    %12 = vector.shape_cast %11 : vector<8xf32> to vector<8x1xf32>
    %13 = tpu.reciprocal %12 {approx = true} : vector<8x1xf32> -> vector<8x1xf32>
    %14 = arith.mulf %12, %13 : vector<8x1xf32>
    %cst_7 = arith.constant 2.000000e+00 : f32
    %15 = vector.broadcast %cst_7 : f32 to vector<8x1xf32>
    %16 = arith.subf %15, %14 : vector<8x1xf32>
    %17 = arith.mulf %13, %16 : vector<8x1xf32>
    %18 = vector.broadcast %17 : vector<8x1xf32> to vector<8x128xf32>
    %19 = arith.mulf %10, %18 : vector<8x128xf32>
    %20 = vector.extract_strided_slice %19 {offsets = [0, 0], sizes = [8, 16], strides = [1, 1]} : vector<8x128xf32> to vector<8x16xf32>
    %c0_8 = arith.constant 0 : index
    %c0_9 = arith.constant 0 : index
    %21 = vector.load %arg4[%c0_8, %c0_9] : memref<8x16xf32, #tpu.memory_space<vmem>>, vector<8x16xf32>
    tpu.vector_store %arg4[%c0_8, %c0_9], %20 {strides = array<i32>} : memref<8x16xf32, #tpu.memory_space<vmem>>, vector<8x16xf32>,
    return
  }
  func.func @transform_0(%arg0: i32) -> (i32, i32) {
    %c0_i32 = arith.constant 0 : i32
    %c0_i32_0 = arith.constant 0 : i32
    return %arg0, %c0_i32 : i32, i32
  }
  func.func @transform_1(%arg0: i32) -> (i32, i32) {
    %c0_i32 = arith.constant 0 : i32
    %c0_i32_0 = arith.constant 0 : i32
    %c0_i32_1 = arith.constant 0 : i32
    return %c0_i32, %c0_i32_0 : i32, i32
  }
  func.func @transform_2(%arg0: i32) -> (i32, i32) {
    %c0_i32 = arith.constant 0 : i32
    %c0_i32_0 = arith.constant 0 : i32
    %c0_i32_1 = arith.constant 0 : i32
    return %c0_i32, %c0_i32_0 : i32, i32
  }
  func.func @transform_3(%arg0: i32) -> (i32, i32) {
    %c0_i32 = arith.constant 0 : i32
    %c0_i32_0 = arith.constant 0 : i32
    return %arg0, %c0_i32 : i32, i32
  }
}

</mosaic_0001>

<bundles_post_ra>
// kernel: tpu_custom_call.1
= control target key start
LH: loop header
LB: loop body
LE: loop exit
PB: predicated region body
PF: predicated region fallthrough
CT: control target
= control target key end

     0   :  { %vm39_vm0 = vcmask 261120   ;;  %v323_v2 = vmov 0.0|0.0   ;;  %vm324_vm2 = vmmov 0   ;;  %v325_v5 = vmov 0.0   ;;  %s436_s0 = inlined_call_operand.vmem [shape: f32[8,32], index: 0, kind: input, shape index: {}]   ;;  %s437_s1 = inlined_call_operand.vmem [shape: f32[128,32], index: 1, kind: input, shape index: {}]   ;;  %s438_s2 = inlined_call_operand.vmem [shape: f32[1,128], index: 2, kind: input, shape index: {}]   ;;  %s439_s3 = inlined_call_operand.hbm [shape: f32[8,16], index: 3, kind: output, shape index: {}]  }
   0x1   :  { %v16_v0 = vld [vmem:[%s437_s1] sm:$0xff]  ;;  %v17_v1 = vld [vmem:[%s437_s1 + $0x8] sm:$0xff]  ;;  %259 = vmatprep.subr.bf16.mxu0 %v323_v2  ;;  %vm355_vm1 = vmpackc.low %vm39_vm0, %vm39_vm0  ;;  %256 = vmatprep.mubr.msk.f32.mxu0 %vm324_vm2, %v325_v5 }
   0x2   :  { %v260_v3 = vpack.c.bf16 %v17_v1, %v16_v0  ;;  %v18_v6 = vld [vmem:[%s437_s1 + $0x10] sm:$0xff]  ;;  %v19_v7 = vld [vmem:[%s437_s1 + $0x18] sm:$0xff] }
   0x4   :  { %262 = vmatpush3.bf16.xpose.msk.msra.mxu0 %vm355_vm1, %v260_v3 }
   0x5   :  { %263 = vmatprep.subr.bf16.mxu0 %v323_v2 }
   0x6   :  { %8 = vsyncpa [#allocation3], 0  ;;  %v264_v8 = vpack.c.bf16 %v19_v7, %v18_v6  ;;  %v20_v9 = vld [vmem:[%s437_s1 + $0x20] sm:$0xff]  ;;  %v21_v10 = vld [vmem:[%s437_s1 + $0x28] sm:$0xff]  ;;  %vm173_vm3 = vcmask 130048  }
   0x7   :  { %v268_v11 = vpack.c.bf16 %v21_v10, %v20_v9  ;;  %v22_v12 = vld [vmem:[%s437_s1 + $0x30] sm:$0xff]  ;;  %v23_v13 = vld [vmem:[%s437_s1 + $0x38] sm:$0xff]  ;;  %v24_v15 = vld [vmem:[%s437_s1 + $0x40] sm:$0xff] }
   0x8   :  { %v272_v14 = vpack.c.bf16 %v23_v13, %v22_v12  ;;  %v25_v16 = vld [vmem:[%s437_s1 + $0x48] sm:$0xff]  ;;  %v26_v18 = vld [vmem:[%s437_s1 + $0x50] sm:$0xff]  ;;  %v27_v19 = vld [vmem:[%s437_s1 + $0x58] sm:$0xff] }
   0x9   :  { %v276_v17 = vpack.c.bf16 %v25_v16, %v24_v15  ;;  %v280_v20 = vpack.c.bf16 %v27_v19, %v26_v18  ;;  %v28_v21 = vld [vmem:[%s437_s1 + $0x60] sm:$0xff]  ;;  %v29_v22 = vld [vmem:[%s437_s1 + $0x68] sm:$0xff]  ;;  %v30_v24 = vld [vmem:[%s437_s1 + $0x70] sm:$0xff] }
   0xa   :  { %v284_v23 = vpack.c.bf16 %v29_v22, %v28_v21  ;;  %v31_v25 = vld [vmem:[%s437_s1 + $0x78] sm:$0xff]  ;;  %v15_v27 = vld [vmem:[%s436_s0] sm:$0xff]  ;;  %s326_s0 = smov [#allocation2]  }
   0xb   :  { %v288_v26 = vpack.c.bf16 %v31_v25, %v30_v24  ;;  %v189_v28 = vld [vmem:[%s438_s2] ss:$0 sm:$0xff]  ;;  %s181_s1 = sshll.u32 %s326_s0, 4  ;;  %s182_s1 = int_to_ptr.vmem [resolvable:$true] %s181_s1 }
   0xc   :  { %266 = vmatpush3.bf16.xpose.msk.msra.mxu0 %vm355_vm1, %v264_v8  ;;  %s299_s2 = scalar_lea.vmem %s182_s1, 128  ;;  %p304_p1 = scmp.lt.s32.totalorder %s182_s1, %s182_s1 }
   0xd   :  { %267 = vmatprep.subr.bf16.mxu0 %v323_v2  ;;  %p300_p0 = scmp.ne.s32.totalorder %s182_s1, %s299_s2  ;;  %p305_p2 = scmp.lt.s32.totalorder %s299_s2, %s299_s2 }
   0xf   :  { %p306_p3 = por %p305_p2, %p304_p1 }
  0x11   :  { %p307_p4 = pnand %p306_p3, %p300_p0 }
  0x14   :  { %270 = vmatpush3.bf16.xpose.msk.msra.mxu0 %vm355_vm1, %v268_v11 }
  0x15   :  { %271 = vmatprep.subr.bf16.mxu0 %v323_v2 }
  0x1c   :  { %274 = vmatpush3.bf16.xpose.msk.msra.mxu0 %vm355_vm1, %v272_v14 }
  0x1d   :  { %275 = vmatprep.subr.bf16.mxu0 %v323_v2 }
  0x24   :  { %278 = vmatpush3.bf16.xpose.msk.msra.mxu0 %vm355_vm1, %v276_v17 }
  0x25   :  { %279 = vmatprep.subr.bf16.mxu0 %v323_v2 }
  0x2c   :  { %282 = vmatpush3.bf16.xpose.msk.msra.mxu0 %vm355_vm1, %v280_v20 }
  0x2d   :  { %283 = vmatprep.subr.bf16.mxu0 %v323_v2 }
  0x34   :  { %286 = vmatpush3.bf16.xpose.msk.msra.mxu0 %vm355_vm1, %v284_v23 }
  0x35   :  { %287 = vmatprep.subr.bf16.mxu0 %v323_v2 }
  0x3c   :  { %290 = vmatpush3.bf16.xpose.msk.msra.mxu0 %vm355_vm1, %v288_v26 }
  0x43   :  { %257 = vmatmul.mubr.msk.f32.vlgmr.msra.gmra.mrb[0].mxu0 %vm39_vm0, %v15_v27 }
 0x116   :  { %v157_v29 = vpop.f32.mrb[0].mxu0 }
 0x117   :  { %v158_v30 = vadd.f32 %v189_v28, %v157_v29  ;;  %v258_v31 = vpop.f32.mrb[1].mxu0 }
 0x119   :  { %161 = vmax.xlane.f32.xlu0 %v158_v30 }
 0x1a6   :  { %v162_v32 = vpop.xlane.xlu0 %161 }
 0x1a7   :  { %v163_v33 = vsub.f32 %v158_v30, %v162_v32 }
 0x1a9   :  { %v164_v34 = vmul.f32 1.442695, %v163_v33 }
 0x1ab   :  { %295 = vpow2.f32 %v164_v34 }
 0x1b5   :  { %v296_v35 = vpop.eup %295 }
 0x1b6   :  { %166 = vadd.xlane.f32.xlu0 %v296_v35 }
 0x243   :  { %v167_v36 = vpop.xlane.xlu0 %166 }
 0x244   :  { %297 = vrcp.f32 %v167_v36 }
 0x24e   :  { %v298_v37 = vpop.eup %297 }
 0x24f   :  { %v169_v38 = vmul.f32 %v298_v37, %v167_v36 }
 0x251   :  { %v170_v39 = vsub.f32 2.0, %v169_v38 }
 0x253   :  { %v171_v40 = vmul.f32 %v298_v37, %v170_v39 }
 0x255   :  { %v172_v41 = vmul.f32 %v296_v35, %v171_v40 }
 0x257   :  { %174 = vst.msk [vmem:[#allocation2] sm:$0xff] %vm173_vm3, %v172_v41 }
 0x258   :  { %310 = shalt.err (!%p307_p4)
}
 0x259   :  { %s311_s23 = scalar_lea.hbm %s439_s3, 128 }
 0x25a   :  { %p312_p5 = scmp.ne.s32.totalorder %s439_s3, %s311_s23  ;;  %p315_p6 = scmp.lt.u32.totalorder %s311_s23, %s439_s3 }
 0x25c   :  { %p317_p7 = pnand %p315_p6, %p312_p5 }
 0x25e   :  { %320 = shalt.err (!%p317_p7)
}
 0x25f   :  { %184 = dma.vmem_to_hbm [thread:$0]  %s182_s1, 128, %s439_s3, [#allocation3]  }
 0x260   :  { %321 = dma.done.wait [#allocation3], 128  }
 0x261   :  { %322 = vsyncadd [#allocation3], 4294967168 }
 0x262   :  { %188 = vsyncpa [#allocation3], 1 }

</bundles_post_ra>
